<compile_context>
chip_gen: v5e
topology: v5e:2x2
jax: 0.10.0
libtpu: 0.0.40
codegen_flags: <defaults>
</compile_context>

<pallas_src>
import functools

import jax
import jax.numpy as jnp
from jax import lax
from jax.experimental import pallas as pl
from jax.experimental.pallas import tpu as pltpu

_LANE = 128
_UNROLL_CHUNKS = 16            # static unroll threshold for the in-tile fold
_BLOCK_BYTES = 8 << 20         # ~8 MiB per input block (x2 when double-buffered)
_VMEM_LIMIT = 48 * 1024 * 1024


def _neutral(dtype):
    """Identity element for max."""
    dtype = jnp.dtype(dtype)
    if jnp.issubdtype(dtype, jnp.floating):
        return float("-inf")
    return int(jnp.iinfo(dtype).min)


def _sublane(dtype):
    """Sublane tiling granularity: 8 (f32), 16 (bf16/f16), 32 (int8/fp8)."""
    return 8 * max(1, 4 // jnp.dtype(dtype).itemsize)


def _rup(v, m):
    return -(-v // m) * m


def _global_max_pool1d_kernel(x_ref, o_ref, acc_ref, *, l_total, tl, chunk_w,
                              nchunks, needs_mask, num_l):
    """Grid = (batch blocks, channel blocks, length tiles); length innermost.

    acc_ref is a (bn, bc, chunk_w) VMEM accumulator in the input layout.  Each
    length tile streams chunk_w-wide chunks from x_ref and folds them with
    elementwise maximum (VPU); the cross-lane reduce (XLU) and the narrow store
    to the lane-dense output happen once per output block, on the last tile.
    """
    j = pl.program_id(2)
    neutral = jnp.asarray(_neutral(x_ref.dtype), dtype=x_ref.dtype)
    last_base = (num_l - 1) * tl          # static element offset of last tile

    if needs_mask:
        # Hoisted once; broadcast inside the compare/select.
        lane_iota = lax.broadcasted_iota(jnp.int32, (1, 1, chunk_w), 2)

    def load_chunk(k, masked):
        start = k * chunk_w
        if not isinstance(start, int):
            start = pl.multiple_of(start, chunk_w)
        v = x_ref[..., pl.ds(start, chunk_w)]
        if masked:
            v = jnp.where(j * tl + start + lane_iota < l_total, v, neutral)
        return v

    def fold_tile(masked, init):
        # Chunks statically known to be fully in-bounds (even on the last tile)
        # never pay for the mask.
        def chunk_needs_mask(k):
            return masked and (last_base + (k + 1) * chunk_w > l_total)

        if nchunks <= _UNROLL_CHUNKS:
            for k in range(nchunks):
                v = load_chunk(k, chunk_needs_mask(k))
                if init and k == 0:
                    acc_ref[...] = v              # fused init, no -inf fill
                else:
                    acc_ref[...] = jnp.maximum(acc_ref[...], v)
        else:
            v0 = load_chunk(0, chunk_needs_mask(0))
            if init:
                acc_ref[...] = v0
            else:
                acc_ref[...] = jnp.maximum(acc_ref[...], v0)

            @pl.loop(1, nchunks)
            def _(k):
                acc_ref[...] = jnp.maximum(acc_ref[...], load_chunk(k, masked))

    def finalize():
        # One cross-lane reduce + one lane-dense store per output block.
        o_ref[...] = jnp.max(acc_ref[...], axis=-1).astype(o_ref.dtype)

    if num_l == 1:
        fold_tile(masked=needs_mask, init=True)
        finalize()
    else:
        last = num_l - 1

        @pl.when(j == 0)
        def _():
            fold_tile(masked=False, init=True)

        if needs_mask:
            @pl.when((j > 0) & (j < last))
            def _():
                fold_tile(masked=False, init=False)

            @pl.when(j == last)
            def _():
                fold_tile(masked=True, init=False)
                finalize()
        else:
            @pl.when(j > 0)
            def _():
                fold_tile(masked=False, init=False)

            @pl.when(j == last)
            def _():
                finalize()


def _choose_tiles(n, c, l, dtype):
    """Pick (batch, channel, length) block sizes.

    Targets ~_BLOCK_BYTES input blocks (double-buffered by the pipeline),
    respects dtype-dependent (sublane, 128) tiling of the last two block dims,
    blocks the channel axis when C alone would blow VMEM, and ensures >=2
    parallel grid blocks for large inputs (both v7x TensorCores get work).
    """
    itemsize = jnp.dtype(dtype).itemsize
    sub = _sublane(dtype)
    target = _BLOCK_BYTES

    # Channel block: full C unless even a minimal (sub, C, 128) block is too big.
    if c <= _LANE or sub * _rup(c, sub) * _LANE * itemsize <= target:
        bc = c
    else:
        bc = max(_LANE, (target // (sub * _LANE * itemsize)) // _LANE * _LANE)
        bc = min(bc, (c // _LANE) * _LANE)
    bc_pad = _rup(bc, sub)

    # Batch block (second-to-last dim of the lane-dense output).
    bn = n if n <= sub else sub

    # Length tile: full (rounded-up) L if it fits, else a multiple of 128.
    l_pad = l if l <= _LANE else _rup(l, _LANE)
    row = bn * bc_pad * itemsize
    if l <= _LANE:
        tl = l
    elif row * l_pad <= target:
        tl = l_pad
    else:
        tl = max(_LANE, min((target // row) // _LANE * _LANE,
                            _UNROLL_CHUNKS * _LANE))

    # Grow the batch block with leftover budget (amortizes grid-step overhead).
    if n > bn:
        fit = (target // (bc_pad * tl * itemsize)) // sub * sub
        if fit >= n:
            bn = n
        elif fit > bn:
            bn = min(fit, (n // sub) * sub)

    # Small-N/C, long-L: spend the remaining budget on a longer tile.
    if bn >= n and bc >= c and l > _LANE and tl < l_pad:
        row = bn * bc_pad * itemsize
        tl = max(tl, min(l_pad, max(_LANE, (target // row) // _LANE * _LANE)))

    # Prefer a length tile that divides L (no masked tail) if it costs < 2x.
    if l > _LANE and tl < l_pad and l % tl != 0:
        for cand in range(tl, _LANE - 1, -_LANE):
            if l % cand == 0:
                if 2 * cand >= tl:
                    tl = cand
                break

    # v7x has 2 TensorCores: make sure the parallel axes have >= 2 blocks when
    # there is enough data to be worth splitting (irrelevant on v5e/v6e).
    if -(-n // bn) == 1 and -(-c // bc) == 1 and n * c * l * itemsize >= (4 << 20):
        if n >= 2 * sub:
            bn = _rup(-(-n // 2), sub)
        elif c >= 2 * _LANE:
            bc = _rup(-(-c // 2), _LANE)

    return int(bn), int(bc), int(tl)


def global_max_pool1d(x: jax.Array, *, block_n=None, block_c=None,
                      block_l=None) -> jax.Array:
    """Max over the last (time) axis. x: (N, C, L) -> (N, C, 1)."""
    n, c, l = x.shape
    sub = _sublane(x.dtype)
    bn, bc, tl = _choose_tiles(n, c, l, x.dtype)

    # Optional overrides, rounded to hardware-legal block sizes.
    if block_n is not None:
        bn = n if int(block_n) >= n else max(sub, (int(block_n) // sub) * sub)
    if block_c is not None:
        bc = c if int(block_c) >= c else max(_LANE, (int(block_c) // _LANE) * _LANE)
    if block_l is not None:
        if l <= _LANE or int(block_l) >= l:
            tl = l if l <= _LANE else _rup(l, _LANE)
        else:
            tl = max(_LANE, (int(block_l) // _LANE) * _LANE)

    chunk_w = _LANE if tl >= _LANE else tl
    nchunks = tl // chunk_w
    num_l = -(-l // tl)
    needs_mask = (l % tl) != 0

    kernel = functools.partial(
        _global_max_pool1d_kernel,
        l_total=l, tl=tl, chunk_w=chunk_w, nchunks=nchunks,
        needs_mask=needs_mask, num_l=num_l)

    out2d = pl.pallas_call(
        kernel,
        out_shape=jax.ShapeDtypeStruct((n, c), x.dtype),
        grid_spec=pltpu.PrefetchScalarGridSpec(
            num_scalar_prefetch=0,
            grid=(-(-n // bn), -(-c // bc), num_l),
            in_specs=[pl.BlockSpec((bn, bc, tl), lambda i, ci, j: (i, ci, j))],
            out_specs=pl.BlockSpec((bn, bc), lambda i, ci, j: (i, ci)),
            scratch_shapes=[pltpu.VMEM((bn, bc, chunk_w), x.dtype)]),
        compiler_params=pltpu.CompilerParams(
            dimension_semantics=("parallel", "parallel", "arbitrary"),
            vmem_limit_bytes=_VMEM_LIMIT),
    )(x)
    # Lane-dense (N, C) result from the kernel; keepdims reshape in the wrapper.
    return out2d[..., None]


if __name__ == "__main__":
    key = jax.random.PRNGKey(0)
    k1, k2, k3, k4 = jax.random.split(key, 4)

    # batch=2, channels=4, num_steps=16: single tile, single chunk.
    x1 = jax.random.normal(k1, (2, 4, 16), dtype=jnp.float32)
    o1 = jax.block_until_ready(global_max_pool1d(x1))
    assert o1.shape == (2, 4, 1), o1.shape
    assert jnp.allclose(o1, jnp.max(x1, axis=-1, keepdims=True)), "mismatch (basic)"

    # Length-tiled reduction (2 tiles) with a masked tail via block_l override.
    x2 = jax.random.normal(k2, (2, 4, 200), dtype=jnp.float32)
    o2 = jax.block_until_ready(global_max_pool1d(x2, block_l=128))
    assert jnp.allclose(o2, jnp.max(x2, axis=-1, keepdims=True)), "mismatch (tiled)"

    # Single tile, several 128-lane chunks, statically-skipped tail mask.
    x3 = jax.random.normal(k3, (2, 4, 300), dtype=jnp.float32)
    o3 = jax.block_until_ready(global_max_pool1d(x3))
    assert jnp.allclose(o3, jnp.max(x3, axis=-1, keepdims=True)), "mismatch (chunks)"

    # bf16 path (dtype-aware sublane granularity).
    x4 = jax.random.normal(k4, (2, 4, 16), dtype=jnp.bfloat16)
    o4 = jax.block_until_ready(global_max_pool1d(x4))
    assert jnp.array_equal(o4, jnp.max(x4, axis=-1, keepdims=True)), "mismatch (bf16)"

    print("KERNEL_OK")
</pallas_src>

<mosaic_0001>
module attributes {stable_mosaic.version = 11 : i64} {
  func.func @_global_max_pool1d_kernel(%arg0: i32, %arg1: i32, %arg2: i32, %arg3: memref<2x4x16xf32, #tpu.memory_space<vmem>>, %arg4: memref<2x4xf32, #tpu.memory_space<vmem>>, %arg5: memref<2x4x16xf32, #tpu.memory_space<vmem>>) attributes {dimension_semantics = [#tpu.dimension_semantics<parallel>, #tpu.dimension_semantics<parallel>, #tpu.dimension_semantics<arbitrary>], iteration_bounds = array<i64: 1, 1, 1>, scalar_prefetch = 0 : i64, scratch_operands = 1 : i64, tpu.core_type = #tpu.core_type<tc>, window_params = [{transform_indices = @transform_0, window_bounds = array<i64: 2, 4, 16>}, {transform_indices = @transform_1, window_bounds = array<i64: 2, 4>}]} {
    %c0 = arith.constant 0 : index
    %c0_0 = arith.constant 0 : index
    %c0_1 = arith.constant 0 : index
    %0 = vector.load %arg3[%c0, %c0_0, %c0_1] : memref<2x4x16xf32, #tpu.memory_space<vmem>>, vector<2x4x16xf32>
    %c0_2 = arith.constant 0 : index
    %c0_3 = arith.constant 0 : index
    %c0_4 = arith.constant 0 : index
    %1 = vector.load %arg5[%c0_2, %c0_3, %c0_4] : memref<2x4x16xf32, #tpu.memory_space<vmem>>, vector<2x4x16xf32>
    tpu.vector_store %arg5[%c0_2, %c0_3, %c0_4], %0 {strides = array<i32>} : memref<2x4x16xf32, #tpu.memory_space<vmem>>, vector<2x4x16xf32>,
    %c0_5 = arith.constant 0 : index
    %c0_6 = arith.constant 0 : index
    %c0_7 = arith.constant 0 : index
    %2 = vector.load %arg5[%c0_5, %c0_6, %c0_7] : memref<2x4x16xf32, #tpu.memory_space<vmem>>, vector<2x4x16xf32>
    %cst = arith.constant dense<0xFF800000> : vector<2x4xf32>
    %3 = vector.multi_reduction <maximumf>, %2, %cst [2] : vector<2x4x16xf32> to vector<2x4xf32>
    %c0_8 = arith.constant 0 : index
    %c0_9 = arith.constant 0 : index
    %4 = vector.load %arg4[%c0_8, %c0_9] : memref<2x4xf32, #tpu.memory_space<vmem>>, vector<2x4xf32>
    tpu.vector_store %arg4[%c0_8, %c0_9], %3 {strides = array<i32>} : memref<2x4xf32, #tpu.memory_space<vmem>>, vector<2x4xf32>,
    return
  }
  func.func @transform_0(%arg0: i32, %arg1: i32, %arg2: i32) -> (i32, i32, i32) {
    %c0_i32 = arith.constant 0 : i32
    return %arg0, %arg1, %arg2 : i32, i32, i32
  }
  func.func @transform_1(%arg0: i32, %arg1: i32, %arg2: i32) -> (i32, i32) {
    %c0_i32 = arith.constant 0 : i32
    return %arg0, %arg1 : i32, i32
  }
}

</mosaic_0001>

<bundles_post_ra>
// kernel: tpu_custom_call.1
= control target key start
LH: loop header
LB: loop body
LE: loop exit
PB: predicated region body
PF: predicated region fallthrough
CT: control target
= control target key end

     0   :  { %6 = vsyncpa [#allocation4], 0  ;;  %s142_s0 = inlined_call_operand.hbm [shape: f32[2,4,16], index: 0, kind: input, shape index: {}]   ;;  %s143_s1 = inlined_call_operand.hbm [shape: f32[2,4], index: 1, kind: output, shape index: {}]  }
   0x1   :  { %7 = vsyncpa [#allocation5], 0  ;;  %s12_s8 = sshll.u32 %s142_s0, 4  ;;  %s122_s9 = smov [#allocation3]   ;;  %s13_s8 = int_to_ptr.hbm [resolvable:$true] %s12_s8 }
   0x2   :  { %s14_s10 = sshll.u32 %s122_s9, 4  ;;  %s123_s11 = smov 64   ;;  %s15_s10 = int_to_ptr.vmem [resolvable:$true] %s14_s10 }
   0x3   :  { %s124_s12 = smov 4  }
   0x4   :  { %20 = dma.hbm_to_vmem [thread:$0]  %s13_s8, 128, %s15_s10, [#allocation4], %s123_s11, %s123_s11, %s124_s12  }
   0x5   :  { %118 = dma.done.wait [#allocation4], 128  }
   0x6   :  { %119 = vsyncadd [#allocation4], 4294967168  ;;  %vm27_vm0 = vcmask 125952   ;;  %v25_v0 = vld [vmem:[#allocation3] sm:$0xf]  ;;  %v40_v7 = vlaneseq  ;;  %s125_s0 = smov [#allocation6]  }
   0x7   :  { %v26_v1 = vld [vmem:[#allocation3 + $0x4] sm:$0xf]  ;;  %28 = vst.msk [vmem:[#allocation2] sm:$0xf] %vm27_vm0, %v25_v0  ;;  %s54_s13 = sshll.u32 %s125_s0, 4  ;;  %s56_s16 = sshll.u32 %s143_s1, 4  ;;  %s55_s13 = int_to_ptr.vmem [resolvable:$true] %s54_s13  ;;  %s57_s16 = int_to_ptr.hbm [resolvable:$true] %s56_s16 }
   0x8   :  { %29 = vst.msk [vmem:[#allocation2 + $0x4] sm:$0xf] %vm27_vm0, %v26_v1  ;;  %v41_v8 = vand.u32 127, %v40_v7  ;;  %vm44_vm1 = vcmask 1041409   ;;  %vm47_vm2 = vcmask 25600  }
   0xe   :  { %v30_v2 = vld [vmem:[#allocation2] sm:$0xf] }
   0xf   :  { %v32_v3 = vsel %vm27_vm0, %v30_v2, -inf  ;;  %v31_v4 = vld [vmem:[#allocation2 + $0x4] sm:$0xf] }
  0x10   :  { %33 = vmax.xlane.f32.xlu0 %v32_v3  ;;  %v35_v5 = vsel %vm27_vm0, %v31_v4, -inf }
  0x18   :  { %36 = vmax.xlane.f32.xlu0 %v35_v5 }
  0x83   :  { %v34_v6 = vpop.xlane.xlu0 %33 }
  0x84   :  { %v42_v10 = vperm.slane %v34_v6, %v41_v8 }
  0x8b   :  { %v37_v9 = vpop.xlane.xlu0 %36 }
  0x8c   :  { %v43_v11 = vperm.slane %v37_v9, %v41_v8 }
  0x8e   :  { %v45_v12 = vsel %vm44_vm1, %v43_v11, %v42_v10 }
  0x8f   :  { %48 = vst.msk [vmem:[#allocation6] sm:$0x3] %vm47_vm2, %v45_v12 }
  0x90   :  { %59 = dma.vmem_to_hbm [thread:$0]  %s55_s13, 32, %s57_s16, [#allocation5]  }
  0x91   :  { %120 = dma.done.wait [#allocation5], 32  }
  0x92   :  { %121 = vsyncadd [#allocation5], 4294967264 }
  0x93   :  { %64 = vsyncpa [#allocation4], 1 }
  0x94   :  { %65 = vsyncpa [#allocation5], 1 }

</bundles_post_ra>
